<compile_context>
chip_gen: v7x
topology: tpu7x:2x2x1
jax: 0.10.0
libtpu: 0.0.40
codegen_flags: <defaults>
</compile_context>

<pallas_src>
import math
from functools import partial

import jax
import jax.numpy as jnp
from jax.experimental import pallas as pl
from jax.experimental.pallas import tpu as pltpu

_MIB = 1024 * 1024
_TM_CANDIDATES = (1024, 512, 256, 128, 64, 32, 16, 8)
_TH_CANDIDATES = (4096, 2048, 1024, 512, 256, 128)


# ----------------------------- sizing helpers ------------------------------

def _round_up(x, m):
    return ((x + m - 1) // m) * m


def _vmem_budget_and_limit():
    """Generation-aware (bytes): (tile-selection budget, Mosaic scoped VMEM limit)."""
    cap = 64 * _MIB  # conservative default = v7x per-TensorCore VMEM
    try:
        info = pltpu.get_tpu_info()
        cap = int(getattr(info, "vmem_capacity_bytes", cap)) or cap
    except Exception:
        pass
    budget = max(24 * _MIB, cap - 20 * _MIB)   # headroom for Mosaic scratch / spills
    limit = max(budget + 8 * _MIB, cap - 8 * _MIB)
    return budget, limit


def _min_tile_m(x_itemsize):
    # Full sublane packing per vreg: 8 rows (32-bit), 16 (bf16), 32 (8-bit).
    if x_itemsize >= 4:
        return 8
    if x_itemsize == 2:
        return 16
    return 32


def _tile_m_cap(m, min_tm):
    # Largest useful TM; also keep >= 2 grid steps along M when M allows so the
    # "parallel" axis can be sharded across v7x's two TensorCores.
    cap = _round_up(m, min_tm)
    if m >= 2 * min_tm:
        cap = min(cap, _round_up((m + 1) // 2, min_tm))
    return cap


def _max_tm_by_m(m, min_tm):
    cap = _tile_m_cap(m, min_tm)
    for tm in _TM_CANDIDATES:
        if min_tm <= tm <= cap:
            return tm
    return min_tm


def _vmem_resident(tm, d_in, h, d_out, x_bytes, w_bytes, o_bytes):
    # Weights single-buffered (pl.Buffered(1)); x/out tiles double-buffered;
    # f32 intermediates dominated by the (TM, H) hidden activation.
    weights = (d_in * h + h * d_out + h + d_out) * w_bytes
    io = 2 * tm * d_in * x_bytes + 2 * tm * d_out * o_bytes
    interm = tm * h * 4 + tm * d_out * 4
    return weights + io + interm


def _vmem_htiled(tm, th, d_in, d_out, x_bytes, w_bytes, o_bytes):
    weights = 2 * (d_in * th + th * d_out + th) * w_bytes + d_out * w_bytes
    io = 2 * tm * d_in * x_bytes + 2 * tm * d_out * o_bytes
    interm = tm * th * 4 + 2 * tm * d_out * 4   # hidden block + f32 accumulator
    return weights + io + interm


def _pick_tile_m_resident(m, d_in, h, d_out, x_bytes, w_bytes, o_bytes, budget, min_tm):
    cap = _tile_m_cap(m, min_tm)
    for tm in _TM_CANDIDATES:
        if tm < min_tm or tm > cap:
            continue
        if _vmem_resident(tm, d_in, h, d_out, x_bytes, w_bytes, o_bytes) <= budget:
            return tm
    return None


def _pick_tiles_htiled(m, d_in, h, d_out, x_bytes, w_bytes, o_bytes, budget, min_tm,
                       th_override=None):
    cap = _tile_m_cap(m, min_tm)
    h_cap = _round_up(h, 128)
    if th_override is not None:
        ths = (min(_round_up(th_override, 128), h_cap),)
    else:
        ths = tuple(th for th in _TH_CANDIDATES if th <= h_cap) or (128,)
    # Prioritize a tall M tile (feeds the 256-wide MXU), then the largest hidden block.
    for tm in _TM_CANDIDATES:
        if tm < min_tm or tm > cap:
            continue
        for th in ths:
            if _vmem_htiled(tm, th, d_in, d_out, x_bytes, w_bytes, o_bytes) <= budget:
                return tm, th
    return min_tm, ths[-1]


# --------------------------------- kernels ---------------------------------

def _gelu(h, approximate):
    if approximate:
        # tanh-GELU runs on the EUP slot (useful on v5e where the f32 erf
        # polynomial can make the VALU the binding unit).
        return jax.nn.gelu(h, approximate=True)
    # Exact erf formulation — matches torch.nn.GELU() default.
    return 0.5 * h * (1.0 + jax.lax.erf(h * (1.0 / math.sqrt(2.0))))


def _mlp_kernel_resident(x_ref, w1_ref, b1_ref, w2_ref, b2_ref, o_ref, *, approximate):
    # x_ref: (TM, D_in)  w1_ref: (D_in, H)  b1_ref: (1, H)
    # w2_ref: (H, D_out) b2_ref: (1, D_out) o_ref: (TM, D_out)
    x = x_ref[...]
    h = jnp.dot(x, w1_ref[...], preferred_element_type=jnp.float32)
    h = h + b1_ref[...].astype(jnp.float32)
    h = _gelu(h, approximate)
    out = jnp.dot(h.astype(w2_ref.dtype), w2_ref[...],
                  preferred_element_type=jnp.float32)
    out = out + b2_ref[...].astype(jnp.float32)
    o_ref[...] = out.astype(o_ref.dtype)


def _mlp_kernel_htiled(x_ref, w1_ref, b1_ref, w2_ref, b2_ref, o_ref, acc_ref, *,
                       approximate):
    # Grid: (M tiles, H blocks); H is an "arbitrary" reduction axis.
    hb = pl.program_id(1)

    @pl.when(hb == 0)
    def _():
        acc_ref[...] = jnp.zeros_like(acc_ref)

    x = x_ref[...]
    h = jnp.dot(x, w1_ref[...], preferred_element_type=jnp.float32)
    h = h + b1_ref[...].astype(jnp.float32)
    h = _gelu(h, approximate)
    acc_ref[...] += jnp.dot(h.astype(w2_ref.dtype), w2_ref[...],
                            preferred_element_type=jnp.float32)

    @pl.when(hb == pl.num_programs(1) - 1)
    def _():
        o_ref[...] = (acc_ref[...] + b2_ref[...].astype(jnp.float32)).astype(o_ref.dtype)


# --------------------------------- wrapper ----------------------------------

@partial(jax.jit, static_argnames=("approximate_gelu", "force_h_tiling", "hidden_block"))
def mlp_forward(x, w1, b1, w2, b2, *, approximate_gelu=False,
                force_h_tiling=False, hidden_block=None):
    """x: (B, N, D_in) -> (B, N, D_out). Weights stored (in, out) order.

    f32 operands are supported but run multi-pass on the bf16-native MXU
    (several times slower); feed bf16 for peak throughput (accumulation stays f32).
    """
    B, N, D_in = x.shape
    H = w1.shape[1]
    D_out = w2.shape[1]
    M = B * N

    x_bytes = x.dtype.itemsize
    w_bytes = w1.dtype.itemsize
    o_bytes = x.dtype.itemsize

    budget, vmem_limit = _vmem_budget_and_limit()
    min_tm = _min_tile_m(x_bytes)

    use_h_tiling = force_h_tiling or (hidden_block is not None)
    tm_resident = None
    if not use_h_tiling:
        tm_resident = _pick_tile_m_resident(M, D_in, H, D_out,
                                            x_bytes, w_bytes, o_bytes, budget, min_tm)
        # Fall back to H-tiling when resident weights + the f32 (TM,H) intermediate
        # squeeze TM below ~256 (or do not fit at all).  Small M alone never triggers it.
        target_tm = min(256, _max_tm_by_m(M, min_tm))
        if tm_resident is None or tm_resident < target_tm:
            use_h_tiling = True

    x2d = x.reshape(M, D_in)
    b1_2d = b1.reshape(1, H)
    b2_2d = b2.reshape(1, D_out)

    if not use_h_tiling:
        TM = tm_resident
        M_pad = _round_up(M, TM)
        if M_pad != M:
            x2d = jnp.pad(x2d, ((0, M_pad - M), (0, 0)))

        flops = 2 * M_pad * (D_in * H + H * D_out)
        bytes_accessed = (M_pad * D_in * x_bytes
                          + (D_in * H + H * D_out + H + D_out) * w_bytes
                          + M_pad * D_out * o_bytes)
        cost = pl.CostEstimate(flops=flops, transcendentals=M_pad * H,
                               bytes_accessed=bytes_accessed)

        resident = pl.Buffered(1)   # constant index_map -> no second buffer
        out2d = pl.pallas_call(
            partial(_mlp_kernel_resident, approximate=approximate_gelu),
            out_shape=jax.ShapeDtypeStruct((M_pad, D_out), x.dtype),
            grid_spec=pltpu.PrefetchScalarGridSpec(
                num_scalar_prefetch=0,
                grid=(M_pad // TM,),
                in_specs=[
                    pl.BlockSpec((TM, D_in), lambda i: (i, 0)),                       # x (streamed)
                    pl.BlockSpec((D_in, H), lambda i: (0, 0), pipeline_mode=resident),  # w1
                    pl.BlockSpec((1, H), lambda i: (0, 0), pipeline_mode=resident),     # b1
                    pl.BlockSpec((H, D_out), lambda i: (0, 0), pipeline_mode=resident), # w2
                    pl.BlockSpec((1, D_out), lambda i: (0, 0), pipeline_mode=resident), # b2
                ],
                out_specs=pl.BlockSpec((TM, D_out), lambda i: (i, 0)),
            ),
            compiler_params=pltpu.CompilerParams(
                dimension_semantics=("parallel",),   # megacore sharding on v7x
                vmem_limit_bytes=vmem_limit,
            ),
            cost_estimate=cost,
        )(x2d, w1, b1_2d, w2, b2_2d)
    else:
        th_override = None
        if hidden_block is not None:
            th_override = hidden_block
        TM, TH = _pick_tiles_htiled(M, D_in, H, D_out,
                                    x_bytes, w_bytes, o_bytes, budget, min_tm,
                                    th_override=th_override)
        M_pad = _round_up(M, TM)
        H_pad = _round_up(H, TH)
        if M_pad != M:
            x2d = jnp.pad(x2d, ((0, M_pad - M), (0, 0)))
        w1p, b1p, w2p = w1, b1_2d, w2
        if H_pad != H:
            # Zero-padding the hidden dim is exact: gelu(0) = 0 contributes nothing to fc2.
            w1p = jnp.pad(w1, ((0, 0), (0, H_pad - H)))
            b1p = jnp.pad(b1_2d, ((0, 0), (0, H_pad - H)))
            w2p = jnp.pad(w2, ((0, H_pad - H), (0, 0)))

        n_m = M_pad // TM
        n_h = H_pad // TH
        flops = 2 * M_pad * (D_in * H_pad + H_pad * D_out)
        bytes_accessed = (M_pad * D_in * x_bytes
                          + n_m * (D_in * H_pad + H_pad * D_out + H_pad + D_out) * w_bytes
                          + M_pad * D_out * o_bytes)
        cost = pl.CostEstimate(flops=flops, transcendentals=M_pad * H_pad,
                               bytes_accessed=bytes_accessed)

        out2d = pl.pallas_call(
            partial(_mlp_kernel_htiled, approximate=approximate_gelu),
            out_shape=jax.ShapeDtypeStruct((M_pad, D_out), x.dtype),
            grid_spec=pltpu.PrefetchScalarGridSpec(
                num_scalar_prefetch=0,
                grid=(n_m, n_h),
                in_specs=[
                    pl.BlockSpec((TM, D_in), lambda i, hb: (i, 0)),    # x (fetched once per i)
                    pl.BlockSpec((D_in, TH), lambda i, hb: (0, hb)),   # w1 column block
                    pl.BlockSpec((1, TH), lambda i, hb: (0, hb)),      # b1 block
                    pl.BlockSpec((TH, D_out), lambda i, hb: (hb, 0)),  # w2 row block
                    pl.BlockSpec((1, D_out), lambda i, hb: (0, 0),
                                 pipeline_mode=pl.Buffered(1)),        # b2 (resident)
                ],
                out_specs=pl.BlockSpec((TM, D_out), lambda i, hb: (i, 0)),
                scratch_shapes=[pltpu.VMEM((TM, D_out), jnp.float32)],
            ),
            compiler_params=pltpu.CompilerParams(
                dimension_semantics=("parallel", "arbitrary"),
                vmem_limit_bytes=vmem_limit,
            ),
            cost_estimate=cost,
        )(x2d, w1p, b1p, w2p, b2_2d)

    if M_pad != M:
        out2d = out2d[:M]
    return out2d.reshape(B, N, D_out)


def init_mlp_params(key, in_features, hidden_features, out_features, dtype=jnp.float32):
    """Deterministic init mimicking nn.Linear (uniform(-1/sqrt(fan_in), 1/sqrt(fan_in)))."""
    k1, k2, k3, k4 = jax.random.split(key, 4)
    bound1 = 1.0 / math.sqrt(in_features)
    bound2 = 1.0 / math.sqrt(hidden_features)
    # Stored as (in, out) so the kernel does x @ W (equivalent to torch's x @ W.T).
    w1 = jax.random.uniform(k1, (in_features, hidden_features), dtype, -bound1, bound1)
    b1 = jax.random.uniform(k2, (hidden_features,), dtype, -bound1, bound1)
    w2 = jax.random.uniform(k3, (hidden_features, out_features), dtype, -bound2, bound2)
    b2 = jax.random.uniform(k4, (out_features,), dtype, -bound2, bound2)
    return w1, b1, w2, b2


if __name__ == "__main__":
    key = jax.random.PRNGKey(0)
    kx, kp = jax.random.split(key)

    # Small but lane-dense ViT-ish shapes: batch=2, seq=8, embed=128, hidden=256.
    B, N, D_in = 2, 8, 128
    H, D_out = 2 * D_in, D_in

    x = jax.random.normal(kx, (B, N, D_in), dtype=jnp.float32)
    w1, b1, w2, b2 = init_mlp_params(kp, D_in, H, D_out)

    ref_h = jax.nn.gelu(x.reshape(-1, D_in) @ w1 + b1, approximate=False)
    ref = (ref_h @ w2 + b2).reshape(B, N, D_out)

    # 1) f32, resident-weights path (single-buffered weights).
    out = jax.block_until_ready(mlp_forward(x, w1, b1, w2, b2))
    assert out.shape == (B, N, D_out)
    assert jnp.allclose(out, ref, atol=1e-5, rtol=1e-5), \
        float(jnp.max(jnp.abs(out - ref)))

    # 2) H-tiled fallback path, forced with a 128-wide hidden block so the
    #    "arbitrary" reduction axis has 2 steps (exercises accumulator + pl.when).
    out_ht = jax.block_until_ready(mlp_forward(x, w1, b1, w2, b2, hidden_block=128))
    assert jnp.allclose(out_ht, ref, atol=1e-5, rtol=1e-5), \
        float(jnp.max(jnp.abs(out_ht - ref)))

    # 3) bf16 operands (MXU-native), f32 accumulation inside the kernel.
    xb = x.astype(jnp.bfloat16)
    w1b, b1b, w2b, b2b = (a.astype(jnp.bfloat16) for a in (w1, b1, w2, b2))
    out_bf16 = jax.block_until_ready(mlp_forward(xb, w1b, b1b, w2b, b2b))
    hb = jax.nn.gelu(xb.astype(jnp.float32) @ w1b.astype(jnp.float32)
                     + b1b.astype(jnp.float32), approximate=False).astype(jnp.bfloat16)
    refb = hb.astype(jnp.float32) @ w2b.astype(jnp.float32) + b2b.astype(jnp.float32)
    assert out_bf16.dtype == jnp.bfloat16
    assert jnp.allclose(out_bf16.astype(jnp.float32), refb, atol=5e-2, rtol=5e-2), \
        float(jnp.max(jnp.abs(out_bf16.astype(jnp.float32) - refb)))

    print("KERNEL_OK")
</pallas_src>

<mosaic_0001>
module attributes {stable_mosaic.version = 11 : i64} {
  func.func @_mlp_kernel_resident(%arg0: i32, %arg1: memref<8x128xf32, #tpu.memory_space<vmem>>, %arg2: memref<128x256xf32, #tpu.memory_space<vmem>>, %arg3: memref<1x256xf32, #tpu.memory_space<vmem>>, %arg4: memref<256x128xf32, #tpu.memory_space<vmem>>, %arg5: memref<1x128xf32, #tpu.memory_space<vmem>>, %arg6: memref<8x128xf32, #tpu.memory_space<vmem>>) attributes {dimension_semantics = [#tpu.dimension_semantics<parallel>], iteration_bounds = array<i64: 2>, scalar_prefetch = 0 : i64, scratch_operands = 0 : i64, tpu.core_type = #tpu.core_type<tc>, window_params = [{transform_indices = @transform_0, window_bounds = array<i64: 8, 128>}, {pipeline_mode = #tpu.pipeline_mode<synchronous>, transform_indices = @transform_1, window_bounds = array<i64: 128, 256>}, {pipeline_mode = #tpu.pipeline_mode<synchronous>, transform_indices = @transform_2, window_bounds = array<i64: 1, 256>}, {pipeline_mode = #tpu.pipeline_mode<synchronous>, transform_indices = @transform_3, window_bounds = array<i64: 256, 128>}, {pipeline_mode = #tpu.pipeline_mode<synchronous>, transform_indices = @transform_4, window_bounds = array<i64: 1, 128>}, {transform_indices = @transform_5, window_bounds = array<i64: 8, 128>}]} {
    %c0 = arith.constant 0 : index
    %c0_0 = arith.constant 0 : index
    %0 = vector.load %arg1[%c0, %c0_0] : memref<8x128xf32, #tpu.memory_space<vmem>>, vector<8x128xf32>
    %c0_1 = arith.constant 0 : index
    %c0_2 = arith.constant 0 : index
    %1 = vector.load %arg2[%c0_1, %c0_2] : memref<128x256xf32, #tpu.memory_space<vmem>>, vector<128x256xf32>
    %cst = arith.constant dense<0.000000e+00> : vector<8x256xf32>
    %2 = tpu.matmul %0, %1, %cst {dimension_numbers = #tpu.dot_dimension_numbers<[1], [0], [0], [1], [0, 0, 1, 1], [], []>} : vector<8x128xf32>, vector<128x256xf32>, vector<8x256xf32> -> vector<8x256xf32>
    %c0_3 = arith.constant 0 : index
    %c0_4 = arith.constant 0 : index
    %3 = vector.load %arg3[%c0_3, %c0_4] : memref<1x256xf32, #tpu.memory_space<vmem>>, vector<1x256xf32>
    %4 = vector.broadcast %3 : vector<1x256xf32> to vector<8x256xf32>
    %5 = arith.addf %2, %4 : vector<8x256xf32>
    %cst_5 = arith.constant 5.000000e-01 : f32
    %6 = vector.broadcast %cst_5 : f32 to vector<8x256xf32>
    %7 = arith.mulf %6, %5 : vector<8x256xf32>
    %cst_6 = arith.constant 0.707106769 : f32
    %8 = vector.broadcast %cst_6 : f32 to vector<8x256xf32>
    %9 = arith.mulf %5, %8 : vector<8x256xf32>
    %10 = math.erf %9 : vector<8x256xf32>
    %cst_7 = arith.constant 1.000000e+00 : f32
    %11 = vector.broadcast %cst_7 : f32 to vector<8x256xf32>
    %12 = arith.addf %11, %10 : vector<8x256xf32>
    %13 = arith.mulf %7, %12 : vector<8x256xf32>
    %c0_8 = arith.constant 0 : index
    %c0_9 = arith.constant 0 : index
    %14 = vector.load %arg4[%c0_8, %c0_9] : memref<256x128xf32, #tpu.memory_space<vmem>>, vector<256x128xf32>
    %cst_10 = arith.constant dense<0.000000e+00> : vector<8x128xf32>
    %15 = tpu.matmul %13, %14, %cst_10 {dimension_numbers = #tpu.dot_dimension_numbers<[1], [0], [0], [1], [0, 0, 1, 1], [], []>} : vector<8x256xf32>, vector<256x128xf32>, vector<8x128xf32> -> vector<8x128xf32>
    %c0_11 = arith.constant 0 : index
    %c0_12 = arith.constant 0 : index
    %16 = vector.load %arg5[%c0_11, %c0_12] : memref<1x128xf32, #tpu.memory_space<vmem>>, vector<1x128xf32>
    %17 = vector.broadcast %16 : vector<1x128xf32> to vector<8x128xf32>
    %18 = arith.addf %15, %17 : vector<8x128xf32>
    %c0_13 = arith.constant 0 : index
    %c0_14 = arith.constant 0 : index
    %19 = vector.load %arg6[%c0_13, %c0_14] : memref<8x128xf32, #tpu.memory_space<vmem>>, vector<8x128xf32>
    tpu.vector_store %arg6[%c0_13, %c0_14], %18 {strides = array<i32>} : memref<8x128xf32, #tpu.memory_space<vmem>>, vector<8x128xf32>,
    return
  }
  func.func @transform_0(%arg0: i32) -> (i32, i32) {
    %c0_i32 = arith.constant 0 : i32
    %c0_i32_0 = arith.constant 0 : i32
    return %arg0, %c0_i32 : i32, i32
  }
  func.func @transform_1(%arg0: i32) -> (i32, i32) {
    %c0_i32 = arith.constant 0 : i32
    %c0_i32_0 = arith.constant 0 : i32
    %c0_i32_1 = arith.constant 0 : i32
    return %c0_i32, %c0_i32_0 : i32, i32
  }
  func.func @transform_2(%arg0: i32) -> (i32, i32) {
    %c0_i32 = arith.constant 0 : i32
    %c0_i32_0 = arith.constant 0 : i32
    %c0_i32_1 = arith.constant 0 : i32
    return %c0_i32, %c0_i32_0 : i32, i32
  }
  func.func @transform_3(%arg0: i32) -> (i32, i32) {
    %c0_i32 = arith.constant 0 : i32
    %c0_i32_0 = arith.constant 0 : i32
    %c0_i32_1 = arith.constant 0 : i32
    return %c0_i32, %c0_i32_0 : i32, i32
  }
  func.func @transform_4(%arg0: i32) -> (i32, i32) {
    %c0_i32 = arith.constant 0 : i32
    %c0_i32_0 = arith.constant 0 : i32
    %c0_i32_1 = arith.constant 0 : i32
    return %c0_i32, %c0_i32_0 : i32, i32
  }
  func.func @transform_5(%arg0: i32) -> (i32, i32) {
    %c0_i32 = arith.constant 0 : i32
    %c0_i32_0 = arith.constant 0 : i32
    return %arg0, %c0_i32 : i32, i32
  }
}

</mosaic_0001>

<bundles_post_ra>
// kernel: mlp_forward.1
= control target key start
LH: loop header
LB: loop body
LE: loop exit
PB: predicated region body
PF: predicated region fallthrough
CT: control target
= control target key end

     0   :  { %10 = vsyncpa [#allocation3], 0  ;;  %s1239_s0 = inlined_call_operand.hbm [shape: f32[16,128], index: 0, kind: input, shape index: {}]   ;;  %s1240_s1 = inlined_call_operand.hbm [shape: f32[128,256], index: 1, kind: input, shape index: {}]   ;;  %s1241_s2 = inlined_call_operand.vmem [shape: f32[1,256], index: 2, kind: input, shape index: {}]   ;;  %s1242_s3 = inlined_call_operand.hbm [shape: f32[256,128], index: 3, kind: input, shape index: {}]   ;;  %s1243_s4 = inlined_call_operand.vmem [shape: f32[1,128], index: 4, kind: input, shape index: {}]   ;;  %s1244_s5 = inlined_call_operand.hbm [shape: f32[16,128], index: 5, kind: output, shape index: {}]  }
   0x1   :  { %12 = vsyncpa [#allocation3 + $0x1], 0 }
   0x2   :  { %13 = vsyncpa [#allocation6], 0 }
   0x3   :  { %14 = vsyncpa [#allocation4], 0 }
   0x4   :  { %16 = vsyncpa [#allocation4 + $0x1], 0  ;;  %s997_s18 = smov 0   ;;  %s999_s19 = smov 0  }
   0x5   :  { %s1001_s20 = smov 0   ;;  %s1003_s21 = smov 0  }
   0x6 LB: > { %s1018_s22 = sadd.s32 4294967295, %s956_s21   ;;  %s608_s23 = sadd.s32 4294967294, %s956_s21   ;;  %s956_s21 = sphi %s1003_s21, %s1264_s21   ;;  %s952_s20 = sphi %s1001_s20, %s1263_s20   ;;  %s948_s19 = sphi %s999_s19, %s1262_s19   ;;  %s944_s18 = sphi %s997_s18, %s1261_s18  }
   0x7   : > { %p42_p0 = scmp.ne.s32.totalorder %s948_s19, %s944_s18  ;;  %p1245_p1 = scmp.eq.s32.totalorder %s1018_s22, 0 }
   0x8   : > { %p156_p3 = scmp.eq.s32.totalorder %s608_s23, 1  ;;  %p609_p5 = scmp.ge.s32.totalorder %s956_s21, 1 }
   0x9   : > { %p1027_p4 = por %p1245_p1, %p42_p0  ;;  %p163_p7 = scmp.lt.s32.totalorder %s956_s21, 3 }
   0xa   : > { %p1032_p6 = por %p156_p3, %p42_p0  ;;  %s958_s27 = smov [#allocation5]  }
   0xb   : > { %s1248_s24 = scalar_select %p1027_p4, 1, 0 }
   0xc   : > { %s1249_s25 = scalar_select %p1032_p6, 1, 0 }
   0xd   : > { %p1037_p8 = pnand %p609_p5, %p163_p7  ;;  %s175_s28 = sshll.u32 %s958_s27, 4  ;;  %s1041_s28 = int_to_ptr.vmem [resolvable:$true] %s175_s28 }
   0xe   : > { %s959_s30 = smov [#allocation7]   ;;  %s800_s9 = scalar_lea.hbm %s1240_s1, 4096 }
   0xf   : > { %p736_p9 = pneg %p1037_p8  ;;  %s191_s6 = sshll.u32 %s959_s30, 4  ;;  %s1052_s6 = int_to_ptr.vmem [resolvable:$true] %s191_s6 }
  0x10   : > { %p801_p12 = scmp.ne.s32.totalorder %s1240_s1, %s800_s9  ;;  %p807_p5 = scmp.lt.u32.totalorder %s800_s9, %s1240_s1 }
  0x11   : > { %p1048_p11 = pnand %p736_p9, %p1245_p1 }
  0x13   : > { %p802_p13 = pneg %p1048_p11 }
  0x15   : > { %p803_p0 = pnand %p802_p13, %p801_p12 }
  0x17   : > { %p804_p3 = pneg %p803_p0 }
  0x19   : > { %p809_p7 = pnand %p807_p5, %p804_p3 }
  0x1b   : > { %812 = shalt.err (!%p809_p7)
}
  0x1c   : > { %s813_s14 = scalar_lea.vmem %s1041_s28, 4096  ;;  %p821_p2 = scmp.lt.s32.totalorder %s1041_s28, %s1041_s28 }
  0x1d   : > { %p814_p9 = scmp.ne.s32.totalorder %s1041_s28, %s813_s14  ;;  %p822_p12 = scmp.lt.s32.totalorder %s813_s14, %s813_s14 }
  0x1f   : > { %p816_p10 = pnand %p814_p9, %p802_p13  ;;  %p823_p0 = por %p822_p12, %p821_p2 }
  0x21   : > { %p817_p1 = pneg %p816_p10 }
  0x23   : > { %p824_p6 = pnand %p823_p0, %p817_p1 }
  0x25   : > { %827 = shalt.err (!%p824_p6)
}
  0x26   : > { %s960_s15 = smov 256   ;;  %s961_s16 = smov 16  }
  0x27   : > { %739 = dma.hbm_to_vmem [thread:$0]  (!%p1048_p11), %s1240_s1, 4096, %s1041_s28, [#allocation6], %s960_s15, %s960_s15, %s961_s16  }
  0x28   : > { %s828_s7 = scalar_lea.hbm %s1242_s3, 4096 }
  0x29   : > { %p829_p2 = scmp.ne.s32.totalorder %s1242_s3, %s828_s7  ;;  %p835_p10 = scmp.lt.u32.totalorder %s828_s7, %s1242_s3 }
  0x2b   : > { %p831_p1 = pnand %p829_p2, %p802_p13 }
  0x2d   : > { %p832_p6 = pneg %p831_p1 }
  0x2f   : > { %p837_p3 = pnand %p835_p10, %p832_p6 }
  0x31   : > { %840 = shalt.err (!%p837_p3)
}
  0x32   : > { %s841_s28 = scalar_lea.vmem %s1052_s6, 4096  ;;  %p849_p12 = scmp.lt.s32.totalorder %s1052_s6, %s1052_s6 }
  0x33   : > { %p842_p5 = scmp.ne.s32.totalorder %s1052_s6, %s841_s28  ;;  %p850_p0 = scmp.lt.s32.totalorder %s841_s28, %s841_s28 }
  0x35   : > { %p844_p7 = pnand %p842_p5, %p802_p13  ;;  %p851_p2 = por %p850_p0, %p849_p12 }
  0x37   : > { %p845_p9 = pneg %p844_p7 }
  0x39   : > { %p852_p1 = pnand %p851_p2, %p845_p9 }
  0x3b   : > { %855 = shalt.err (!%p852_p1)
}
  0x3c   : > { %s962_s12 = smov 128   ;;  %s963_s13 = smov 8  }
  0x3d   : > { %742 = dma.hbm_to_vmem [thread:$0]  (!%p1048_p11), %s1242_s3, 4096, %s1052_s6, [#allocation6], %s962_s12, %s962_s12, %s963_s13  }
  0x3e   : > { %s1107_s16 = sadd.s32 1, %s956_s21   ;;  %s29_s23 = sadd.s32 1, %s952_s20 }
  0x3f   : > { %s26_s17 = ssub.s32 %s956_s21, %s1107_s16  ;;  %p36_p6 = scmp.ne.s32.totalorder %s952_s20, %s948_s19 }
  0x40   : > { %p27_p13 = scmp.eq.s32.totalorder %s26_s17, 0  ;;  %p37_p10 = scmp.eq.s32.totalorder %s956_s21, 0 }
  0x41   : > { %p1252_p5 = scmp.eq.s32.totalorder %s1018_s22, 1  ;;  %p753_p9 = scmp.lt.s32.totalorder %s956_s21, 2 }
  0x42   : > { %s1116_s27 = scalar_select %p27_p13, %s952_s20, %s29_s23  }
  0x43   : > { %p38_p3 = por %p37_p10, %p36_p6  ;;  %p1120_p7 = por %p1252_p5, %p36_p6 }
  0x44   : > { %s208_s29 = sand.u32 1, %s952_s20   ;;  %s614_s6 = sshll.u32 %s956_s21, 7 }
  0x45   : > { %s1253_s30 = scalar_select %p1120_p7, 1, 0 }
  0x46   : > { %s613_s7 = sshll.u32 %s208_s29, 3  ;;  %s1130_s10 = scalar_lea.hbm %s1239_s0, %s614_s6 }
  0x47   : > { %s212_s11 = scalar_lea.vmem [#allocation2], %s613_s7  ;;  %p1134_p11 = pnand %p753_p9, %p38_p3 }
  0x48   : > { %s219_s28 = sshll.u32 %s212_s11, 4  ;;  %s209_s13 = scalar_lea.sflag [#allocation3], %s208_s29  ;;  %s1132_s28 = int_to_ptr.vmem [resolvable:$true] %s219_s28 }
  0x49   : > { %s856_s14 = scalar_lea.hbm %s1130_s10, 128  ;;  %p858_p0 = pneg %p1134_p11 }
  0x4a   : > { %p857_p12 = scmp.ne.s32.totalorder %s1130_s10, %s856_s14  ;;  %s861_s23 = scalar_lea.hbm %s1239_s0, 256 }
  0x4b   : > { %p862_p13 = scmp.lt.u32.totalorder %s1130_s10, %s1239_s0  ;;  %p863_p6 = scmp.lt.u32.totalorder %s861_s23, %s856_s14 }
  0x4c   : > { %p859_p2 = pnand %p858_p0, %p857_p12  ;;  %p865_p3 = scmp.lt.u32.totalorder %s856_s14, %s1130_s10 }
  0x4d   : > { %p864_p10 = por %p863_p6, %p862_p13 }
  0x4e   : > { %p860_p1 = pneg %p859_p2 }
  0x4f   : > { %p866_p5 = por %p865_p3, %p864_p10 }
  0x51   : > { %p867_p9 = pnand %p866_p5, %p860_p1 }
  0x53   : > { %870 = shalt.err (!%p867_p9)
}
  0x54   : > { %s871_s29 = scalar_lea.vmem %s1132_s28, 128  ;;  %s964_s8 = smov [#allocation2]  }
  0x55   : > { %p872_p12 = scmp.ne.s32.totalorder %s1132_s28, %s871_s29  ;;  %s876_s9 = sshll.u32 %s964_s8, 4  ;;  %s877_s9 = int_to_ptr.vmem [resolvable:$false] %s876_s9 }
  0x56   : > { %s878_s11 = scalar_lea.vmem %s877_s9, 256  ;;  %p879_p4 = scmp.lt.s32.totalorder %s1132_s28, %s877_s9 }
  0x57   : > { %p874_p2 = pnand %p872_p12, %p858_p0  ;;  %p880_p13 = scmp.lt.s32.totalorder %s878_s11, %s871_s29 }
  0x59   : > { %p875_p7 = pneg %p874_p2  ;;  %p881_p6 = por %p880_p13, %p879_p4 }
  0x5b   : > { %p882_p10 = pnand %p881_p6, %p875_p7 }
  0x5d   : > { %885 = shalt.err (!%p882_p10)
}
  0x5e   : > { %746 = dma.hbm_to_vmem [thread:$0]  (!%p1134_p11), %s1130_s10, 128, %s1132_s28, %s209_s13  }
  0x5f   : > { %228 = sbr.rel (%p1037_p8) target bundleno = 605 (0x25d), region = 40  ;;  %s1166_s14 = sand.u32 (!%p1037_p8), 1, %s948_s19  }
  0x60   : > { %s616_s15 = sshll.u32 (!%p1037_p8), %s1166_s14, 3  ;;  %s231_s17 = scalar_lea.sflag (!%p1037_p8), [#allocation3], %s1166_s14 }
  0x61   : > { %s1172_s23 = scalar_lea.vmem (!%p1037_p8), [#allocation2], %s616_s15  ;;  %p1255_p4 = scmp.ne.s32.totalorder (!%p1037_p8), %s1248_s24, 0 }
  0x66   : > { %931 = dma.done.wait (%p1255_p4), %s231_s17, 128  }
  0x67   : > { %933 = vsyncadd (%p1255_p4), %s231_s17, 4294967168  ;;  %p1256_p7 = scmp.eq.s32.totalorder %s1018_s22, 0 }
  0x69   : > { %935 = dma.done.wait (%p1256_p7), [#allocation6], 8192   ;;  %p1257_p8 = pmov %p1256_p7 }
  0x6a   : > { %v965_v0 = vmov 0.0   ;;  %v271_v1 = vld [vmem:[#allocation5 + $0x8] sm:$0xff]  ;;  %v273_v2 = vld [vmem:[#allocation5 + $0x18] sm:$0xff]  ;;  %v270_v3 = vld [vmem:[#allocation5] sm:$0xff]  ;;  %s622_s12 = sshll.u32 %s1018_s22, 7  ;;  %s268_s13 = scalar_lea.vmem [#allocation8], %s616_s15 }
  0x6b   : > { %937 = vsyncadd (%p1257_p8), [#allocation6], 4294959104  ;;  %378 = vmatprep.mubr.f32.mxu0 %v965_v0  ;;  %v660_v4 = vpack.c.bf16 %v273_v2, %v271_v1  ;;  %v272_v5 = vld [vmem:[#allocation5 + $0x10] sm:$0xff]  ;;  %v275_v6 = vld [vmem:[#allocation5 + $0x28] sm:$0xff]  ;;  %s519_s7 = sshll.u32 %s268_s13, 4  ;;  %s1195_s8 = scalar_lea.hbm %s1244_s5, %s622_s12  ;;  %s1197_s7 = int_to_ptr.vmem [resolvable:$true] %s519_s7 }
  0x6c   : > { %v277_v7 = vld [vmem:[#allocation5 + $0x38] sm:$0xff]  ;;  %v662_v8 = vpack.c.bf16 %v272_v5, %v270_v3  ;;  %v274_v10 = vld [vmem:[#allocation5 + $0x20] sm:$0xff]  ;;  %v276_v11 = vld [vmem:[#allocation5 + $0x30] sm:$0xff]  ;;  %s506_s9 = scalar_lea.sflag [#allocation4], %s1166_s14  ;;  %s886_s11 = scalar_lea.vmem %s1197_s7, 128 }
  0x6d   : > { %v664_v9 = vpack.c.bf16 %v277_v7, %v275_v6  ;;  %v279_v12 = vld [vmem:[#allocation5 + $0x48] sm:$0xff]  ;;  %661 = vmatprep.subr.bf16.mxu0 %v660_v4  ;;  %v281_v13 = vld [vmem:[#allocation5 + $0x58] sm:$0xff]  ;;  %v666_v14 = vpack.c.bf16 %v276_v11, %v274_v10  ;;  %v278_v16 = vld [vmem:[#allocation5 + $0x40] sm:$0xff]  ;;  %p887_p11 = scmp.ne.s32.totalorder %s1197_s7, %s886_s11  ;;  %p1258_p0 = scmp.ne.s32.totalorder %s1253_s30, 0 }
  0x6e   : > { %663 = vmatpush1.bf16.msra.mxu0 %v662_v8  ;;  %v668_v15 = vpack.c.bf16 %v281_v13, %v279_v12  ;;  %v280_v17 = vld [vmem:[#allocation5 + $0x50] sm:$0xff]  ;;  %v283_v18 = vld [vmem:[#allocation5 + $0x68] sm:$0xff]  ;;  %v285_v19 = vld [vmem:[#allocation5 + $0x78] sm:$0xff]  ;;  %s966_s22 = smov [#allocation8]  }
  0x6f   : > { %665 = vmatprep.subr.bf16.mxu0 %v664_v9  ;;  %v670_v20 = vpack.c.bf16 %v280_v17, %v278_v16  ;;  %v672_v21 = vpack.c.bf16 %v285_v19, %v283_v18  ;;  %v282_v22 = vld [vmem:[#allocation5 + $0x60] sm:$0xff]  ;;  %v284_v23 = vld [vmem:[#allocation5 + $0x70] sm:$0xff]  ;;  %v287_v24 = vld [vmem:[#allocation5 + $0x88] sm:$0xff]  ;;  %p888_p1 = pnand %p887_p11, %p1258_p0  ;;  %s890_s15 = sshll.u32 %s966_s22, 4  ;;  %s891_s15 = int_to_ptr.vmem [resolvable:$false] %s890_s15 }
  0x70   : > { %v289_v25 = vld [vmem:[#allocation5 + $0x98] sm:$0xff]  ;;  %v286_v26 = vld [vmem:[#allocation5 + $0x80] sm:$0xff]  ;;  %v288_v27 = vld [vmem:[#allocation5 + $0x90] sm:$0xff]  ;;  %v674_v31 = vpack.c.bf16 %v284_v23, %v282_v22  ;;  %s892_s17 = scalar_lea.vmem %s891_s15, 256  ;;  %p893_p5 = scmp.lt.s32.totalorder %s1197_s7, %s891_s15 }
  0x71   : > { %v411_v28 = vld [vmem:[#allocation7 + $0x80] sm:$0xff]  ;;  %v412_v29 = vld [vmem:[#allocation7 + $0x88] sm:$0xff]  ;;  %v413_v34 = vld [vmem:[#allocation7 + $0x90] sm:$0xff]  ;;  %v676_v36 = vpack.c.bf16 %v289_v25, %v287_v24  ;;  %v678_v46 = vpack.c.bf16 %v288_v27, %v286_v26  ;;  %p889_p3 = pneg %p888_p1  ;;  %p894_p9 = scmp.lt.s32.totalorder %s892_s17, %s886_s11 }
  0x72   : > { %667 = vmatpush1.bf16.msra.mxu0 %v666_v14  ;;  %v395_v30 = vld [vmem:[#allocation7] sm:$0xff]  ;;  %v692_v32 = vpack.c.bf16 %v412_v29, %v411_v28  ;;  %v396_v33 = vld [vmem:[#allocation7 + $0x8] sm:$0xff]  ;;  %v414_v35 = vld [vmem:[#allocation7 + $0x98] sm:$0xff] }
  0x73   : > { %669 = vmatprep.subr.bf16.mxu0 %v668_v15  ;;  %v694_v37 = vpack.c.bf16 %v396_v33, %v395_v30  ;;  %v696_v38 = vpack.c.bf16 %v414_v35, %v413_v34  ;;  %v397_v39 = vld [vmem:[#allocation7 + $0x10] sm:$0xff]  ;;  %v398_v40 = vld [vmem:[#allocation7 + $0x18] sm:$0xff]  ;;  %v415_v41 = vld [vmem:[#allocation7 + $0xa0] sm:$0xff]  ;;  %v304_v34 = vlaneseq  ;;  %p895_p12 = por %p894_p9, %p893_p5 }
  0x74   : > { %v291_v42 = vld [vmem:[#allocation5 + $0xa8] sm:$0xff]  ;;  %v293_v43 = vld [vmem:[#allocation5 + $0xb8] sm:$0xff]  ;;  %693 = vmatprep.subr.bf16.mxu1 %v692_v32  ;;  %v698_v45 = vpack.c.bf16 %v398_v40, %v397_v39  ;;  %v399_v48 = vld [vmem:[#allocation7 + $0x20] sm:$0xff] }
  0x75   : > { %v416_v44 = vld [vmem:[#allocation7 + $0xa8] sm:$0xff]  ;;  %695 = vmatpush3.bf16.msra.mxu1 %v694_v37  ;;  %v680_v50 = vpack.c.bf16 %v293_v43, %v291_v42  ;;  %v290_v51 = vld [vmem:[#allocation5 + $0xa0] sm:$0xff]  ;;  %v292_v52 = vld [vmem:[#allocation5 + $0xb0] sm:$0xff]  ;;  %v305_v35 = vshrl.u32 %v304_v34, 7  ;;  %p896_p2 = pnand %p895_p12, %p889_p3 }
  0x76   : > { %671 = vmatpush1.bf16.msra.mxu0 %v670_v20  ;;  %697 = vmatprep.subr.bf16.mxu1 %v696_v38  ;;  %v700_v47 = vpack.c.bf16 %v416_v44, %v415_v41  ;;  %v400_v49 = vld [vmem:[#allocation7 + $0x28] sm:$0xff]  ;;  %v297_v54 = vld [vmem:[#allocation5 + $0xd8] sm:$0xff]  ;;  %v682_v56 = vpack.c.bf16 %v292_v52, %v290_v51  ;;  %v294_v58 = vld [vmem:[#allocation5 + $0xc0] sm:$0xff] }
  0x77   : > { %673 = vmatprep.subr.bf16.mxu0 %v672_v21  ;;  %v295_v53 = vld [vmem:[#allocation5 + $0xc8] sm:$0xff]  ;;  %v702_v55 = vpack.c.bf16 %v400_v49, %v399_v48  ;;  %v296_v59 = vld [vmem:[#allocation5 + $0xd0] sm:$0xff]  ;;  %v301_v61 = vld [vmem:[#allocation5 + $0xf8] sm:$0xff]  ;;  %v310_v38 = vsub.s32 1, %v305_v35 }
  0x78   : > { %v684_v57 = vpack.c.bf16 %v297_v54, %v295_v53  ;;  %v299_v60 = vld [vmem:[#allocation5 + $0xe8] sm:$0xff]  ;;  %v686_v62 = vpack.c.bf16 %v296_v59, %v294_v58  ;;  %v298_v0 = vld [vmem:[#allocation5 + $0xe0] sm:$0xff]  ;;  %v300_v1 = vld [vmem:[#allocation5 + $0xf0] sm:$0xff] }
  0x79   : > { %699 = vmatpush3.bf16.msra.mxu1 %v698_v45  ;;  %v688_v63 = vpack.c.bf16 %v301_v61, %v299_v60  ;;  %v690_v2 = vpack.c.bf16 %v300_v1, %v298_v0  ;;  %v269_v3 = vld [vmem:[%s1172_s23] sm:$0xff]  ;;  %v419_v10 = vld [vmem:[#allocation7 + $0xc0] sm:$0xff]  ;;  %v420_v11 = vld [vmem:[#allocation7 + $0xc8] sm:$0xff] }
  0x7a   : > { %675 = vmatpush1.bf16.msra.mxu0 %v674_v31  ;;  %701 = vmatprep.subr.bf16.mxu1 %v700_v47  ;;  %v417_v4 = vld [vmem:[#allocation7 + $0xb0] sm:$0xff]  ;;  %v418_v5 = vld [vmem:[#allocation7 + $0xb8] sm:$0xff]  ;;  %v708_v12 = vpack.c.bf16 %v420_v11, %v419_v10  ;;  %v403_v13 = vld [vmem:[#allocation7 + $0x40] sm:$0xff] }
  0x7b   : > { %677 = vmatprep.subr.bf16.mxu0 %v676_v36  ;;  %v704_v6 = vpack.c.bf16 %v418_v5, %v417_v4  ;;  %v401_v7 = vld [vmem:[#allocation7 + $0x30] sm:$0xff]  ;;  %v402_v8 = vld [vmem:[#allocation7 + $0x38] sm:$0xff]  ;;  %v404_v14 = vld [vmem:[#allocation7 + $0x48] sm:$0xff]  ;;  %v306_v36 = vsub.s32 0, %v305_v35 }
  0x7c   : > { %v706_v9 = vpack.c.bf16 %v402_v8, %v401_v7  ;;  %v710_v15 = vpack.c.bf16 %v404_v14, %v403_v13  ;;  %v421_v16 = vld [vmem:[#allocation7 + $0xd0] sm:$0xff]  ;;  %v422_v17 = vld [vmem:[#allocation7 + $0xd8] sm:$0xff]  ;;  %v423_v22 = vld [vmem:[#allocation7 + $0xe0] sm:$0xff] }
  0x7d   : > { %703 = vmatpush3.bf16.msra.mxu1 %v702_v55  ;;  %v712_v18 = vpack.c.bf16 %v422_v17, %v421_v16  ;;  %v405_v19 = vld [vmem:[#allocation7 + $0x50] sm:$0xff]  ;;  %v406_v20 = vld [vmem:[#allocation7 + $0x58] sm:$0xff]  ;;  %v424_v23 = vld [vmem:[#allocation7 + $0xe8] sm:$0xff] }
  0x7e   : > { %679 = vmatpush1.bf16.msra.mxu0 %v678_v46  ;;  %705 = vmatprep.subr.bf16.mxu1 %v704_v6  ;;  %v714_v21 = vpack.c.bf16 %v406_v20, %v405_v19  ;;  %v716_v24 = vpack.c.bf16 %v424_v23, %v423_v22  ;;  %v407_v25 = vld [vmem:[#allocation7 + $0x60] sm:$0xff]  ;;  %v408_v26 = vld [vmem:[#allocation7 + $0x68] sm:$0xff]  ;;  %v425_v28 = vld [vmem:[#allocation7 + $0xf0] sm:$0xff] }
  0x7f   : > { %681 = vmatprep.subr.bf16.mxu0 %v680_v50  ;;  %v718_v27 = vpack.c.bf16 %v408_v26, %v407_v25  ;;  %v426_v29 = vld [vmem:[#allocation7 + $0xf8] sm:$0xff]  ;;  %v409_v31 = vld [vmem:[#allocation7 + $0x70] sm:$0xff] }
  0x80   : > { %v720_v30 = vpack.c.bf16 %v426_v29, %v425_v28  ;;  %v410_v32 = vld [vmem:[#allocation7 + $0x78] sm:$0xff]  ;;  %v302_v37 = vld [vmem:[%s1241_s2] sm:$0x3] }
  0x81   : > { %707 = vmatpush3.bf16.msra.mxu1 %v706_v9  ;;  %v722_v33 = vpack.c.bf16 %v410_v32, %v409_v31  ;;  %v307_v39 = vrot.slane %v302_v37, %v306_v36  ;;  %v311_v40 = vrot.slane %v302_v37, %v310_v38 }
  0x82   : > { %683 = vmatpush1.bf16.msra.mxu0 %v682_v56  ;;  %709 = vmatprep.subr.bf16.mxu1 %v708_v12  ;;  %v620_v56 = vld [vmem:[%s1243_s4] ss:$0 sm:$0xff] }
  0x83   : > { %685 = vmatprep.subr.bf16.mxu0 %v684_v57 }
  0x85   : > { %711 = vmatpush3.bf16.msra.mxu1 %v710_v15 }
  0x86   : > { %687 = vmatpush1.bf16.msra.mxu0 %v686_v62  ;;  %713 = vmatprep.subr.bf16.mxu1 %v712_v18 }
  0x87   : > { %689 = vmatprep.subr.bf16.mxu0 %v688_v63 }
  0x89   : > { %715 = vmatpush3.bf16.msra.mxu1 %v714_v21 }
  0x8a   : > { %691 = vmatpush1.bf16.msra.mxu0 %v690_v2  ;;  %717 = vmatprep.subr.bf16.mxu1 %v716_v24 }
  0x8d   : > { %379 = vmatmul.mubr.f32.vlgmr.msra.gmra.mrb[0].mxu0 %v269_v3  ;;  %719 = vmatpush3.bf16.msra.mxu1 %v718_v27 }
  0x8e   : > { %721 = vmatprep.subr.bf16.mxu1 %v720_v30 }
  0x91   : > { %723 = vmatpush3.bf16.msra.mxu1 %v722_v33 }
 0x160   : > { %v380_v41 = vpop.f32.mrb[0].mxu0 }
 0x161   : > { %v381_v42 = vadd.f32 %v380_v41, %v307_v39  ;;  %v382_v43 = vpop.f32.mrb[1].mxu0 }
 0x162   : > { %v383_v44 = vadd.f32 %v382_v43, %v311_v40 }
 0x163   : > { %v387_v45 = vmul.f32 0.70710677, %v381_v42  ;;  %v385_v52 = vmul.f32 0.5, %v381_v42 }
 0x164   : > { %v388_v46 = vmul.f32 0.70710677, %v383_v44  ;;  %v386_v50 = vmul.f32 0.5, %v383_v44 }
 0x165   : > { %796 = verf.f32 %v387_v45 }
 0x166   : > { %798 = verf.f32 %v388_v46 }
 0x16f   : > { %v797_v47 = vpop.eup %796 }
 0x170   : > { %v799_v48 = vpop.eup %798  ;;  %v391_v49 = vadd.f32 1.0, %v797_v47 }
 0x171   : > { %v392_v51 = vadd.f32 1.0, %v799_v48 }
 0x172   : > { %v393_v54 = vmul.f32 %v391_v49, %v385_v52 }
 0x173   : > { %v394_v53 = vmul.f32 %v392_v51, %v386_v50 }
 0x175   : > { %498 = vmatprep.mubr.f32.mxu1 %v394_v53 }
 0x176   : > { %499 = vmatmul.mubr.f32.vlgmr.msra.gmra.mrb[0].mxu1 %v393_v54 }
 0x249   : > { %v657_v55 = vpop.f32.mrb[0].mxu1 }
 0x24a   : > { %v658_v57 = vpop.f32.mrb[1].mxu1 }
 0x24b   : > { %v659_v58 = vadd.f32 %v658_v57, %v657_v55 }
 0x24d   : > { %v501_v59 = vadd.f32 %v659_v58, %v620_v56 }
 0x24f   : > { %504 = vst [vmem:[%s268_s13] sm:$0xff] %v501_v59 }
 0x250   : > { %899 = shalt.err (!%p896_p2)
}
 0x251   : > { %s900_s14 = scalar_lea.hbm %s1195_s8, 128  ;;  %s904_s26 = scalar_lea.hbm %s1244_s5, 256 }
 0x252   : > { %p901_p13 = scmp.ne.s32.totalorder %s1195_s8, %s900_s14  ;;  %p905_p4 = scmp.lt.u32.totalorder %s1195_s8, %s1244_s5 }
 0x253   : > { %p906_p7 = scmp.lt.u32.totalorder %s904_s26, %s900_s14  ;;  %p908_p11 = scmp.lt.u32.totalorder %s900_s14, %s1195_s8 }
 0x254   : > { %p902_p6 = pnand %p901_p13, %p1258_p0 }
 0x255   : > { %p907_p8 = por %p906_p7, %p905_p4 }
 0x256   : > { %p903_p10 = pneg %p902_p6 }
 0x257   : > { %p909_p1 = por %p908_p11, %p907_p8 }
 0x259   : > { %p910_p3 = pnand %p909_p1, %p903_p10 }
 0x25b   : > { %913 = shalt.err (!%p910_p3)
}
 0x25c   : > { %734 = dma.vmem_to_hbm [thread:$0]  (%p1258_p0), %s1197_s7, 128, %s1195_s8, %s506_s9  }
 0x25d PF: > { %s531_s12 = sand.u32 1, %s944_s18   ;;  %p1259_p5 = scmp.ne.s32.totalorder %s1249_s25, 0 }
 0x25e   : > { %p1260_p9 = scmp.ge.s32.totalorder %s956_s21, 2  ;;  %s532_s13 = scalar_lea.sflag [#allocation4], %s531_s12 }
 0x260   : > { %p748_p12 = pnand %p1260_p9, %p1259_p5 }
 0x262   : > { %939 = dma.done.wait (!%p748_p12), %s532_s13, 128  }
 0x263   : > { %941 = vsyncadd (!%p748_p12), %s532_s13, 4294967168  ;;  %p19_p2 = scmp.ge.s32.totalorder %s1107_s16, 4   ;;  %s1261_s18 = smov %s948_s19 }
 0x264   : > { %s1262_s19 = smov %s952_s20  ;;  %s1263_s20 = smov %s1116_s27 }
 0x265   : > { %s1264_s21 = smov %s1107_s16  ;;  %21 = sbr.rel (!%p19_p2) target bundleno = 6 (0x6), region = 93 }
 0x26c   :  { %537 = vsyncpa [#allocation3], 1 }
 0x26d   :  { %539 = vsyncpa [#allocation3 + $0x1], 1 }
 0x26e   :  { %540 = vsyncpa [#allocation6], 1 }
 0x26f   :  { %541 = vsyncpa [#allocation4], 1 }
 0x270   :  { %543 = vsyncpa [#allocation4 + $0x1], 1 }

</bundles_post_ra>
